<compile_context>
chip_gen: v7x
topology: tpu7x:2x2x1
jax: 0.10.0
libtpu: 0.0.40
codegen_flags: <defaults>
</compile_context>

<pallas_src>
import jax
import jax.numpy as jnp
from jax.experimental import pallas as pl
from jax.experimental.pallas import tpu as pltpu


def _linear_kernel(x_ref, w_ref, b_ref, o_ref):
    """One (tm, tn) output tile; K (=768) is fully resident -> a single MXU dot."""
    acc = jnp.dot(x_ref[...], w_ref[...], preferred_element_type=jnp.float32)
    o_ref[...] = (acc + b_ref[...].astype(jnp.float32)).astype(o_ref.dtype)


def _round_up(v, m):
    return ((v + m - 1) // m) * m


def _tpu_defaults():
    """Generation-aware VMEM budget / cap and a megacore (2-TC) hint."""
    kind = ""
    try:
        dev = jax.devices()[0]
        if dev.platform == "tpu":
            kind = dev.device_kind.lower()
    except Exception:
        pass
    if "v7" in kind:
        # 64 MiB physical VMEM, 2 TensorCores per chip.
        return {"budget": 20 << 20, "cap": 44 << 20, "two_tc": True}
    if "v6" in kind:
        # 128 MiB physical VMEM -> bigger tiles are a free roofline win.
        return {"budget": 48 << 20, "cap": 100 << 20, "two_tc": False}
    if "v5" in kind:
        # 16 MiB scoped default (128 MiB physical); keep budget under it,
        # raise the explicit limit so the large-M tiling path is reliable.
        return {"budget": 14 << 20, "cap": 64 << 20, "two_tc": False}
    # Unknown TPU: conservative defaults.
    return {"budget": 14 << 20, "cap": 32 << 20, "two_tc": False}


def siam_linear(x, w_t, b, *, out_dtype=jnp.float32):
    """y = x @ w_t + b.  w_t is (in_features, out_features), b is (1, out)."""
    M, K = x.shape
    K2, N = w_t.shape
    assert K == K2 and b.shape == (1, N)
    w_t = w_t.astype(x.dtype)  # no-op unless the caller mixed dtypes

    cfg = _tpu_defaults()
    budget = cfg["budget"]
    in_b = jnp.dtype(x.dtype).itemsize
    bias_b = jnp.dtype(b.dtype).itemsize
    out_b = jnp.dtype(out_dtype).itemsize

    def footprint(tm, tn):
        # BlockSpec double-buffers every operand (~2x).
        return 2 * (tm * K * in_b + K * tn * in_b + tn * bias_b + tm * tn * out_b)

    def fits(tm, tn):
        return footprint(tm, tn) <= budget

    # ---- choose tm (M tile).  K is never tiled. ----------------------------
    if fits(M, min(N, 128)):
        tm = M  # full M dim -> legal for any M (no multiple-of-8 requirement)
    else:
        tm = 512
        while tm > 8 and not fits(tm, 128):
            tm //= 2

    # ---- choose tn (N tile).  Prefer whole-N: weight slab DMAed only once. --
    if fits(tm, N):
        tn = N
    else:
        avail = budget - 2 * tm * K * in_b
        per_col = 2 * (K * in_b + bias_b + tm * out_b)
        tn_max = max(128, (avail // per_col) // 128 * 128)
        # Balance N tiles to minimize ragged / padded-column waste.
        n_tiles = pl.cdiv(N, tn_max)
        tn = min(N, _round_up(pl.cdiv(N, n_tiles), 128))

    gm = pl.cdiv(M, tm)
    gn = pl.cdiv(N, tn)

    # v7x: 2 TensorCores per chip -> never leave one idle on a (1,1) grid.
    if cfg["two_tc"] and gm * gn == 1 and N >= 256:
        tn = min(N, _round_up(pl.cdiv(N, 2), 128))
        gn = pl.cdiv(N, tn)

    # N is the OUTER grid axis, M the inner one: the (K, tn) weight block index
    # is constant over the inner M sweep, so Pallas keeps it resident in VMEM
    # instead of re-streaming it from HBM for every M tile.
    grid = (gn, gm)

    vmem_limit = int(min(cfg["cap"], max(footprint(tm, tn) + (8 << 20), 16 << 20)))

    cost = pl.CostEstimate(
        flops=2 * M * K * N,
        transcendentals=0,
        # x is re-read once per N tile; the weight slab is read exactly once.
        bytes_accessed=gn * M * K * in_b + K * N * in_b + N * bias_b + M * N * out_b,
    )

    return pl.pallas_call(
        _linear_kernel,
        out_shape=jax.ShapeDtypeStruct((M, N), out_dtype),
        grid_spec=pltpu.PrefetchScalarGridSpec(
            num_scalar_prefetch=0,
            grid=grid,
            in_specs=[
                pl.BlockSpec((tm, K), lambda j, i: (i, 0)),   # x rows, K whole
                pl.BlockSpec((K, tn), lambda j, i: (0, j)),   # weight slab
                pl.BlockSpec((1, tn), lambda j, i: (0, j)),   # bias slab
            ],
            out_specs=pl.BlockSpec((tm, tn), lambda j, i: (i, j)),
        ),
        compiler_params=pltpu.CompilerParams(
            dimension_semantics=("parallel", "parallel"),
            vmem_limit_bytes=vmem_limit,
        ),
        cost_estimate=cost,
    )(x, w_t, b)


class SiamSimilaratyPallas:
    """JAX/Pallas port of SiamSimilaraty: a single Linear(768, hid_size).

    use_bf16=True casts activations/weights to bfloat16 at the kernel boundary
    (f32 MXU accumulation + f32 bias) -> ~2x less HBM weight traffic at ~1e-2
    relative error vs the f32 PyTorch module.
    """

    IN_FEATURES = 768

    def __init__(self, hid_size=768, key=None, use_bf16=False):
        if key is None:
            key = jax.random.PRNGKey(0)
        kw, kb = jax.random.split(key)
        # Deterministic init mimicking nn.Linear's uniform(-1/sqrt(in), 1/sqrt(in)).
        bound = 1.0 / jnp.sqrt(jnp.float32(self.IN_FEATURES))
        w_t = jax.random.uniform(
            kw, (self.IN_FEATURES, hid_size), jnp.float32, -bound, bound
        )
        self.b = jax.random.uniform(kb, (1, hid_size), jnp.float32, -bound, bound)
        self.compute_dtype = jnp.bfloat16 if use_bf16 else jnp.float32
        self.w_t = w_t.astype(self.compute_dtype)  # cast once, not per call

    def __call__(self, x):
        return siam_linear(x.astype(self.compute_dtype), self.w_t, self.b)

    def paired_call(self, x1, x2):
        """Both siamese towers through ONE pallas_call: pays the launch cost and
        the 768-row weight DMA once instead of twice."""
        n1 = x1.shape[0]
        y = self(jnp.concatenate([x1, x2], axis=0))
        return y[:n1], y[n1:]

    # TODO(synk): fit() (TripletMarginLoss + Adam training loop) is training
    # logic, not part of the forward pass, and is not translated to Pallas.


if __name__ == "__main__":
    key = jax.random.PRNGKey(0)
    k_in1, k_in2, k_model = jax.random.split(key, 3)

    batch = 8
    hid_size = 256  # small hid_size; in_features fixed at 768 by the module
    x = jax.random.normal(k_in1, (batch, 768), jnp.float32)

    # f32 path: exact parity with the PyTorch module's forward semantics.
    model = SiamSimilaratyPallas(hid_size=hid_size, key=k_model)
    y = jax.block_until_ready(model(x))
    y_ref = x @ model.w_t + model.b
    assert y.shape == (batch, hid_size)
    assert jnp.allclose(y, y_ref, atol=1e-4, rtol=1e-4)

    # bf16 perf path (opt-in): halved HBM traffic, ~1e-2 relative error.
    model_bf16 = SiamSimilaratyPallas(hid_size=hid_size, key=k_model, use_bf16=True)
    y_bf = jax.block_until_ready(model_bf16(x))
    assert jnp.allclose(y_bf, y_ref, atol=3e-2, rtol=3e-2)

    # Siamese amortization: both towers in a single kernel launch.
    x2 = jax.random.normal(k_in2, (batch, 768), jnp.float32)
    y1, y2 = model.paired_call(x, x2)
    jax.block_until_ready((y1, y2))
    assert jnp.allclose(y1, y_ref, atol=1e-4, rtol=1e-4)
    assert jnp.allclose(y2, x2 @ model.w_t + model.b, atol=1e-4, rtol=1e-4)

    print("KERNEL_OK")
</pallas_src>

<mosaic_0001>
module attributes {stable_mosaic.version = 11 : i64} {
  func.func @_linear_kernel(%arg0: i32, %arg1: i32, %arg2: memref<8x768xf32, #tpu.memory_space<vmem>>, %arg3: memref<768x256xf32, #tpu.memory_space<vmem>>, %arg4: memref<1x256xf32, #tpu.memory_space<vmem>>, %arg5: memref<8x256xf32, #tpu.memory_space<vmem>>) attributes {dimension_semantics = [#tpu.dimension_semantics<parallel>, #tpu.dimension_semantics<parallel>], iteration_bounds = array<i64: 1, 1>, scalar_prefetch = 0 : i64, scratch_operands = 0 : i64, tpu.core_type = #tpu.core_type<tc>, window_params = [{transform_indices = @transform_0, window_bounds = array<i64: 8, 768>}, {transform_indices = @transform_1, window_bounds = array<i64: 768, 256>}, {transform_indices = @transform_2, window_bounds = array<i64: 1, 256>}, {transform_indices = @transform_3, window_bounds = array<i64: 8, 256>}]} {
    %c0 = arith.constant 0 : index
    %c0_0 = arith.constant 0 : index
    %0 = vector.load %arg2[%c0, %c0_0] : memref<8x768xf32, #tpu.memory_space<vmem>>, vector<8x768xf32>
    %c0_1 = arith.constant 0 : index
    %c0_2 = arith.constant 0 : index
    %1 = vector.load %arg3[%c0_1, %c0_2] : memref<768x256xf32, #tpu.memory_space<vmem>>, vector<768x256xf32>
    %cst = arith.constant dense<0.000000e+00> : vector<8x256xf32>
    %2 = tpu.matmul %0, %1, %cst {dimension_numbers = #tpu.dot_dimension_numbers<[1], [0], [0], [1], [0, 0, 1, 1], [], []>} : vector<8x768xf32>, vector<768x256xf32>, vector<8x256xf32> -> vector<8x256xf32>
    %c0_3 = arith.constant 0 : index
    %c0_4 = arith.constant 0 : index
    %3 = vector.load %arg4[%c0_3, %c0_4] : memref<1x256xf32, #tpu.memory_space<vmem>>, vector<1x256xf32>
    %4 = vector.broadcast %3 : vector<1x256xf32> to vector<8x256xf32>
    %5 = arith.addf %2, %4 : vector<8x256xf32>
    %c0_5 = arith.constant 0 : index
    %c0_6 = arith.constant 0 : index
    %6 = vector.load %arg5[%c0_5, %c0_6] : memref<8x256xf32, #tpu.memory_space<vmem>>, vector<8x256xf32>
    tpu.vector_store %arg5[%c0_5, %c0_6], %5 {strides = array<i32>} : memref<8x256xf32, #tpu.memory_space<vmem>>, vector<8x256xf32>,
    return
  }
  func.func @transform_0(%arg0: i32, %arg1: i32) -> (i32, i32) {
    %c0_i32 = arith.constant 0 : i32
    %c0_i32_0 = arith.constant 0 : i32
    return %arg1, %c0_i32 : i32, i32
  }
  func.func @transform_1(%arg0: i32, %arg1: i32) -> (i32, i32) {
    %c0_i32 = arith.constant 0 : i32
    %c0_i32_0 = arith.constant 0 : i32
    return %c0_i32, %arg0 : i32, i32
  }
  func.func @transform_2(%arg0: i32, %arg1: i32) -> (i32, i32) {
    %c0_i32 = arith.constant 0 : i32
    %c0_i32_0 = arith.constant 0 : i32
    return %c0_i32, %arg0 : i32, i32
  }
  func.func @transform_3(%arg0: i32, %arg1: i32) -> (i32, i32) {
    %c0_i32 = arith.constant 0 : i32
    return %arg1, %arg0 : i32, i32
  }
}

</mosaic_0001>

<bundles_post_ra>
// kernel: tpu_custom_call.1
= control target key start
LH: loop header
LB: loop body
LE: loop exit
PB: predicated region body
PF: predicated region fallthrough
CT: control target
= control target key end

     0   :  { %8 = vsyncpa [#allocation3], 0  ;;  %s828_s0 = inlined_call_operand.hbm [shape: f32[8,768], index: 0, kind: input, shape index: {}]   ;;  %s829_s1 = inlined_call_operand.hbm [shape: f32[768,256], index: 1, kind: input, shape index: {}]   ;;  %s830_s2 = inlined_call_operand.vmem [shape: f32[1,256], index: 2, kind: input, shape index: {}]   ;;  %s831_s3 = inlined_call_operand.hbm [shape: f32[8,256], index: 3, kind: output, shape index: {}]  }
   0x1   :  { %9 = vsyncpa [#allocation6], 0 }
   0x2   :  { %10 = vsyncpa [#allocation4], 0  ;;  %s757_s12 = smov [#allocation2]   ;;  %s758_s14 = smov [#allocation5]  }
   0x3   :  { %s17_s13 = sshll.u32 %s757_s12, 4  ;;  %s26_s15 = sshll.u32 %s758_s14, 4  ;;  %s18_s13 = int_to_ptr.vmem [resolvable:$true] %s17_s13  ;;  %s782_s15 = int_to_ptr.vmem [resolvable:$true] %s26_s15 }
   0x4   :  { %s685_s18 = scalar_lea.hbm %s828_s0, 768 }
   0x5   :  { %p686_p0 = scmp.ne.s32.totalorder %s828_s0, %s685_s18  ;;  %p689_p1 = scmp.lt.u32.totalorder %s685_s18, %s828_s0 }
   0x7   :  { %p691_p2 = pnand %p689_p1, %p686_p0 }
   0x9   :  { %694 = shalt.err (!%p691_p2)
}
   0xa   :  { %s695_s23 = scalar_lea.vmem %s18_s13, 768  ;;  %p700_p4 = scmp.lt.s32.totalorder %s18_s13, %s18_s13 }
   0xb   :  { %p696_p3 = scmp.ne.s32.totalorder %s18_s13, %s695_s23  ;;  %p701_p5 = scmp.lt.s32.totalorder %s695_s23, %s695_s23 }
   0xd   :  { %p702_p6 = por %p701_p5, %p700_p4 }
   0xf   :  { %p703_p7 = pnand %p702_p6, %p696_p3 }
  0x11   :  { %706 = shalt.err (!%p703_p7)
}
  0x12   :  { %20 = dma.hbm_to_vmem [thread:$0]  %s828_s0, 768, %s18_s13, [#allocation3]  }
  0x13   :  { %s707_s28 = scalar_lea.hbm %s829_s1, 24576 }
  0x14   :  { %p708_p8 = scmp.ne.s32.totalorder %s829_s1, %s707_s28  ;;  %p711_p9 = scmp.lt.u32.totalorder %s707_s28, %s829_s1 }
  0x16   :  { %p713_p10 = pnand %p711_p9, %p708_p8 }
  0x18   :  { %716 = shalt.err (!%p713_p10)
}
  0x19   :  { %s717_s6 = scalar_lea.vmem %s782_s15, 24576  ;;  %p722_p12 = scmp.lt.s32.totalorder %s782_s15, %s782_s15 }
  0x1a   :  { %p718_p11 = scmp.ne.s32.totalorder %s782_s15, %s717_s6  ;;  %p723_p13 = scmp.lt.s32.totalorder %s717_s6, %s717_s6 }
  0x1c   :  { %p724_p0 = por %p723_p13, %p722_p12 }
  0x1e   :  { %p725_p1 = pnand %p724_p0, %p718_p11 }
  0x20   :  { %728 = shalt.err (!%p725_p1)
}
  0x21   :  { %s759_s0 = smov 256   ;;  %s760_s7 = smov 16  }
  0x22   :  { %32 = dma.hbm_to_vmem [thread:$0]  %s829_s1, 24576, %s782_s15, [#allocation6], %s759_s0, %s759_s0, %s760_s7  }
  0x23   :  { %751 = dma.done.wait [#allocation3], 768  }
  0x24   :  { %752 = vsyncadd [#allocation3], 4294966528 }
  0x25   :  { %753 = dma.done.wait [#allocation6], 24576  }
  0x26   :  { %754 = vsyncadd [#allocation6], 4294942720  ;;  %v112_v0 = vld [vmem:[#allocation5 + $0x208] sm:$0xff]  ;;  %v114_v1 = vld [vmem:[#allocation5 + $0x218] sm:$0xff]  ;;  %s761_s11 = smov [#allocation7]  }
  0x27   :  { %v111_v2 = vld [vmem:[#allocation5 + $0x200] sm:$0xff]  ;;  %v546_v3 = vpack.c.bf16 %v114_v1, %v112_v0  ;;  %v113_v4 = vld [vmem:[#allocation5 + $0x210] sm:$0xff]  ;;  %v116_v5 = vld [vmem:[#allocation5 + $0x228] sm:$0xff]  ;;  %s472_s12 = sshll.u32 %s761_s11, 4  ;;  %s473_s12 = int_to_ptr.vmem [resolvable:$true] %s472_s12 }
  0x28   :  { %v118_v6 = vld [vmem:[#allocation5 + $0x238] sm:$0xff]  ;;  %v548_v7 = vpack.c.bf16 %v113_v4, %v111_v2  ;;  %v115_v9 = vld [vmem:[#allocation5 + $0x220] sm:$0xff]  ;;  %v117_v10 = vld [vmem:[#allocation5 + $0x230] sm:$0xff]  ;;  %s729_s13 = scalar_lea.vmem %s473_s12, 256  ;;  %p734_p3 = scmp.lt.s32.totalorder %s473_s12, %s473_s12 }
  0x29   :  { %v550_v8 = vpack.c.bf16 %v118_v6, %v116_v5  ;;  %v120_v11 = vld [vmem:[#allocation5 + $0x248] sm:$0xff]  ;;  %547 = vmatprep.subr.bf16.mxu0 %v546_v3  ;;  %v122_v12 = vld [vmem:[#allocation5 + $0x258] sm:$0xff]  ;;  %v552_v13 = vpack.c.bf16 %v117_v10, %v115_v9  ;;  %v119_v15 = vld [vmem:[#allocation5 + $0x240] sm:$0xff]  ;;  %p730_p2 = scmp.ne.s32.totalorder %s473_s12, %s729_s13  ;;  %p735_p4 = scmp.lt.s32.totalorder %s729_s13, %s729_s13 }
  0x2a   :  { %549 = vmatpush1.bf16.msra.mxu0 %v548_v7  ;;  %v554_v14 = vpack.c.bf16 %v122_v12, %v120_v11  ;;  %v121_v16 = vld [vmem:[#allocation5 + $0x250] sm:$0xff]  ;;  %v124_v17 = vld [vmem:[#allocation5 + $0x268] sm:$0xff]  ;;  %v126_v18 = vld [vmem:[#allocation5 + $0x278] sm:$0xff] }
  0x2b   :  { %551 = vmatprep.subr.bf16.mxu0 %v550_v8  ;;  %v556_v19 = vpack.c.bf16 %v121_v16, %v119_v15  ;;  %v558_v20 = vpack.c.bf16 %v126_v18, %v124_v17  ;;  %v123_v21 = vld [vmem:[#allocation5 + $0x260] sm:$0xff]  ;;  %v125_v22 = vld [vmem:[#allocation5 + $0x270] sm:$0xff]  ;;  %v128_v23 = vld [vmem:[#allocation5 + $0x288] sm:$0xff]  ;;  %p736_p5 = por %p735_p4, %p734_p3 }
  0x2c   :  { %v130_v24 = vld [vmem:[#allocation5 + $0x298] sm:$0xff]  ;;  %v560_v25 = vpack.c.bf16 %v125_v22, %v123_v21  ;;  %v127_v27 = vld [vmem:[#allocation5 + $0x280] sm:$0xff]  ;;  %v129_v28 = vld [vmem:[#allocation5 + $0x290] sm:$0xff] }
  0x2d   :  { %v562_v26 = vpack.c.bf16 %v130_v24, %v128_v23  ;;  %v132_v29 = vld [vmem:[#allocation5 + $0x2a8] sm:$0xff]  ;;  %v134_v30 = vld [vmem:[#allocation5 + $0x2b8] sm:$0xff]  ;;  %v564_v31 = vpack.c.bf16 %v129_v28, %v127_v27  ;;  %v131_v33 = vld [vmem:[#allocation5 + $0x2a0] sm:$0xff]  ;;  %p737_p6 = pnand %p736_p5, %p730_p2 }
  0x2e   :  { %553 = vmatpush1.bf16.msra.mxu0 %v552_v13  ;;  %v566_v32 = vpack.c.bf16 %v134_v30, %v132_v29  ;;  %v133_v34 = vld [vmem:[#allocation5 + $0x2b0] sm:$0xff]  ;;  %v136_v35 = vld [vmem:[#allocation5 + $0x2c8] sm:$0xff]  ;;  %v138_v36 = vld [vmem:[#allocation5 + $0x2d8] sm:$0xff] }
  0x2f   :  { %555 = vmatprep.subr.bf16.mxu0 %v554_v14  ;;  %v568_v37 = vpack.c.bf16 %v133_v34, %v131_v33  ;;  %v135_v38 = vld [vmem:[#allocation5 + $0x2c0] sm:$0xff]  ;;  %v137_v39 = vld [vmem:[#allocation5 + $0x2d0] sm:$0xff]  ;;  %v48_v40 = vld [vmem:[#allocation5 + $0x8] sm:$0xff]  ;;  %v570_v41 = vpack.c.bf16 %v138_v36, %v136_v35 }
  0x30   :  { %v140_v42 = vld [vmem:[#allocation5 + $0x2e8] sm:$0xff]  ;;  %v142_v43 = vld [vmem:[#allocation5 + $0x2f8] sm:$0xff]  ;;  %v47_v46 = vld [vmem:[#allocation5] sm:$0xff]  ;;  %v572_v51 = vpack.c.bf16 %v137_v39, %v135_v38 }
  0x31   :  { %v50_v44 = vld [vmem:[#allocation5 + $0x18] sm:$0xff]  ;;  %v49_v47 = vld [vmem:[#allocation5 + $0x10] sm:$0xff]  ;;  %v44_v48 = vld [vmem:[#allocation2 + $0x18] sm:$0xff]  ;;  %v574_v54 = vpack.c.bf16 %v142_v43, %v140_v42 }
  0x32   :  { %557 = vmatpush1.bf16.msra.mxu0 %v556_v19  ;;  %v482_v45 = vpack.c.bf16 %v50_v44, %v48_v40  ;;  %v484_v49 = vpack.c.bf16 %v49_v47, %v47_v46  ;;  %386 = vmatprep.mubr.f32.mxu0 %v44_v48  ;;  %v52_v50 = vld [vmem:[#allocation5 + $0x28] sm:$0xff]  ;;  %v139_v52 = vld [vmem:[#allocation5 + $0x2e0] sm:$0xff]  ;;  %v54_v53 = vld [vmem:[#allocation5 + $0x38] sm:$0xff] }
  0x33   :  { %559 = vmatprep.subr.bf16.mxu0 %v558_v20  ;;  %v141_v55 = vld [vmem:[#allocation5 + $0x2f0] sm:$0xff]  ;;  %v486_v56 = vpack.c.bf16 %v54_v53, %v52_v50  ;;  %v51_v57 = vld [vmem:[#allocation5 + $0x20] sm:$0xff]  ;;  %v144_v59 = vld [vmem:[#allocation5 + $0x308] sm:$0xff] }
  0x34   :  { %483 = vmatprep.subr.bf16.mxu1 %v482_v45  ;;  %v53_v58 = vld [vmem:[#allocation5 + $0x30] sm:$0xff]  ;;  %v146_v60 = vld [vmem:[#allocation5 + $0x318] sm:$0xff]  ;;  %v56_v62 = vld [vmem:[#allocation5 + $0x48] sm:$0xff]  ;;  %v576_v0 = vpack.c.bf16 %v141_v55, %v139_v52 }
  0x35   :  { %485 = vmatpush1.bf16.msra.mxu1 %v484_v49  ;;  %v488_v61 = vpack.c.bf16 %v53_v58, %v51_v57  ;;  %v58_v63 = vld [vmem:[#allocation5 + $0x58] sm:$0xff]  ;;  %v143_v1 = vld [vmem:[#allocation5 + $0x300] sm:$0xff]  ;;  %v57_v4 = vld [vmem:[#allocation5 + $0x50] sm:$0xff]  ;;  %v578_v5 = vpack.c.bf16 %v146_v60, %v144_v59 }
  0x36   :  { %561 = vmatpush1.bf16.msra.mxu0 %v560_v25  ;;  %487 = vmatprep.subr.bf16.mxu1 %v486_v56  ;;  %v490_v2 = vpack.c.bf16 %v58_v63, %v56_v62  ;;  %v55_v3 = vld [vmem:[#allocation5 + $0x40] sm:$0xff]  ;;  %v145_v6 = vld [vmem:[#allocation5 + $0x310] sm:$0xff]  ;;  %v60_v8 = vld [vmem:[#allocation5 + $0x68] sm:$0xff] }
  0x37   :  { %563 = vmatprep.subr.bf16.mxu0 %v562_v26  ;;  %v492_v7 = vpack.c.bf16 %v57_v4, %v55_v3  ;;  %v62_v9 = vld [vmem:[#allocation5 + $0x78] sm:$0xff]  ;;  %v148_v10 = vld [vmem:[#allocation5 + $0x328] sm:$0xff]  ;;  %v59_v13 = vld [vmem:[#allocation5 + $0x60] sm:$0xff]  ;;  %v580_v15 = vpack.c.bf16 %v145_v6, %v143_v1 }
  0x38   :  { %v150_v11 = vld [vmem:[#allocation5 + $0x338] sm:$0xff]  ;;  %v494_v12 = vpack.c.bf16 %v62_v9, %v60_v8  ;;  %v61_v14 = vld [vmem:[#allocation5 + $0x70] sm:$0xff]  ;;  %v64_v16 = vld [vmem:[#allocation5 + $0x88] sm:$0xff] }
  0x39   :  { %489 = vmatpush1.bf16.msra.mxu1 %v488_v61  ;;  %v66_v17 = vld [vmem:[#allocation5 + $0x98] sm:$0xff]  ;;  %v582_v18 = vpack.c.bf16 %v150_v11, %v148_v10  ;;  %v147_v19 = vld [vmem:[#allocation5 + $0x320] sm:$0xff]  ;;  %v149_v20 = vld [vmem:[#allocation5 + $0x330] sm:$0xff]  ;;  %v496_v22 = vpack.c.bf16 %v61_v14, %v59_v13 }
  0x3a   :  { %565 = vmatpush1.bf16.msra.mxu0 %v564_v31  ;;  %491 = vmatprep.subr.bf16.mxu1 %v490_v2  ;;  %v152_v21 = vld [vmem:[#allocation5 + $0x348] sm:$0xff]  ;;  %v154_v23 = vld [vmem:[#allocation5 + $0x358] sm:$0xff]  ;;  %v498_v24 = vpack.c.bf16 %v66_v17, %v64_v16  ;;  %v63_v25 = vld [vmem:[#allocation5 + $0x80] sm:$0xff]  ;;  %v584_v29 = vpack.c.bf16 %v149_v20, %v147_v19 }
  0x3b   :  { %567 = vmatprep.subr.bf16.mxu0 %v566_v32  ;;  %v65_v26 = vld [vmem:[#allocation5 + $0x90] sm:$0xff]  ;;  %v68_v27 = vld [vmem:[#allocation5 + $0xa8] sm:$0xff]  ;;  %v70_v28 = vld [vmem:[#allocation5 + $0xb8] sm:$0xff]  ;;  %v586_v30 = vpack.c.bf16 %v154_v23, %v152_v21 }
  0x3c   :  { %v151_v31 = vld [vmem:[#allocation5 + $0x340] sm:$0xff]  ;;  %v153_v32 = vld [vmem:[#allocation5 + $0x350] sm:$0xff]  ;;  %v156_v33 = vld [vmem:[#allocation5 + $0x368] sm:$0xff]  ;;  %v500_v34 = vpack.c.bf16 %v65_v26, %v63_v25  ;;  %v502_v36 = vpack.c.bf16 %v70_v28, %v68_v27 }
  0x3d   :  { %493 = vmatpush1.bf16.msra.mxu1 %v492_v7  ;;  %v158_v35 = vld [vmem:[#allocation5 + $0x378] sm:$0xff]  ;;  %v69_v38 = vld [vmem:[#allocation5 + $0xb0] sm:$0xff]  ;;  %v72_v39 = vld [vmem:[#allocation5 + $0xc8] sm:$0xff] }
  0x3e   :  { %569 = vmatpush1.bf16.msra.mxu0 %v568_v37  ;;  %495 = vmatprep.subr.bf16.mxu1 %v494_v12  ;;  %v67_v37 = vld [vmem:[#allocation5 + $0xa0] sm:$0xff]  ;;  %v74_v40 = vld [vmem:[#allocation5 + $0xd8] sm:$0xff]  ;;  %v590_v42 = vpack.c.bf16 %v158_v35, %v156_v33  ;;  %v157_v44 = vld [vmem:[#allocation5 + $0x370] sm:$0xff] }
  0x3f   :  { %571 = vmatprep.subr.bf16.mxu0 %v570_v41  ;;  %v588_v41 = vpack.c.bf16 %v153_v32, %v151_v31  ;;  %v155_v43 = vld [vmem:[#allocation5 + $0x360] sm:$0xff]  ;;  %v160_v45 = vld [vmem:[#allocation5 + $0x388] sm:$0xff]  ;;  %v504_v46 = vpack.c.bf16 %v69_v38, %v67_v37  ;;  %v162_v47 = vld [vmem:[#allocation5 + $0x398] sm:$0xff]  ;;  %v506_v48 = vpack.c.bf16 %v74_v40, %v72_v39 }
  0x40   :  { %v71_v49 = vld [vmem:[#allocation5 + $0xc0] sm:$0xff]  ;;  %v73_v50 = vld [vmem:[#allocation5 + $0xd0] sm:$0xff]  ;;  %v78_v52 = vld [vmem:[#allocation5 + $0xf8] sm:$0xff]  ;;  %v592_v53 = vpack.c.bf16 %v157_v44, %v155_v43 }
  0x41   :  { %497 = vmatpush1.bf16.msra.mxu1 %v496_v22  ;;  %v159_v55 = vld [vmem:[#allocation5 + $0x380] sm:$0xff]  ;;  %v161_v56 = vld [vmem:[#allocation5 + $0x390] sm:$0xff]  ;;  %v164_v57 = vld [vmem:[#allocation5 + $0x3a8] sm:$0xff]  ;;  %v508_v58 = vpack.c.bf16 %v73_v50, %v71_v49 }
  0x42   :  { %573 = vmatpush1.bf16.msra.mxu0 %v572_v51  ;;  %499 = vmatprep.subr.bf16.mxu1 %v498_v24  ;;  %v76_v51 = vld [vmem:[#allocation5 + $0xe8] sm:$0xff]  ;;  %v166_v59 = vld [vmem:[#allocation5 + $0x3b8] sm:$0xff]  ;;  %v75_v61 = vld [vmem:[#allocation5 + $0xe0] sm:$0xff]  ;;  %v596_v1 = vpack.c.bf16 %v161_v56, %v159_v55 }
  0x43   :  { %575 = vmatprep.subr.bf16.mxu0 %v574_v54  ;;  %v594_v54 = vpack.c.bf16 %v162_v47, %v160_v45  ;;  %v510_v60 = vpack.c.bf16 %v78_v52, %v76_v51  ;;  %v77_v62 = vld [vmem:[#allocation5 + $0xf0] sm:$0xff]  ;;  %v80_v63 = vld [vmem:[#allocation5 + $0x108] sm:$0xff]  ;;  %v598_v2 = vpack.c.bf16 %v166_v59, %v164_v57  ;;  %v163_v3 = vld [vmem:[#allocation5 + $0x3a0] sm:$0xff] }
  0x44   :  { %v165_v4 = vld [vmem:[#allocation5 + $0x3b0] sm:$0xff]  ;;  %v512_v6 = vpack.c.bf16 %v77_v62, %v75_v61  ;;  %v170_v7 = vld [vmem:[#allocation5 + $0x3d8] sm:$0xff]  ;;  %v79_v9 = vld [vmem:[#allocation5 + $0x100] sm:$0xff] }
  0x45   :  { %501 = vmatpush1.bf16.msra.mxu1 %v500_v34  ;;  %v81_v10 = vld [vmem:[#allocation5 + $0x110] sm:$0xff]  ;;  %v84_v11 = vld [vmem:[#allocation5 + $0x128] sm:$0xff]  ;;  %v86_v12 = vld [vmem:[#allocation5 + $0x138] sm:$0xff]  ;;  %v600_v13 = vpack.c.bf16 %v165_v4, %v163_v3 }
  0x46   :  { %577 = vmatpush1.bf16.msra.mxu0 %v576_v0  ;;  %503 = vmatprep.subr.bf16.mxu1 %v502_v36  ;;  %v82_v0 = vld [vmem:[#allocation5 + $0x118] sm:$0xff]  ;;  %v169_v16 = vld [vmem:[#allocation5 + $0x3d0] sm:$0xff]  ;;  %v172_v17 = vld [vmem:[#allocation5 + $0x3e8] sm:$0xff]  ;;  %v518_v20 = vpack.c.bf16 %v86_v12, %v84_v11 }
  0x47   :  { %579 = vmatprep.subr.bf16.mxu0 %v578_v5  ;;  %v168_v5 = vld [vmem:[#allocation5 + $0x3c8] sm:$0xff]  ;;  %v514_v8 = vpack.c.bf16 %v82_v0, %v80_v63  ;;  %v174_v19 = vld [vmem:[#allocation5 + $0x3f8] sm:$0xff]  ;;  %v83_v21 = vld [vmem:[#allocation5 + $0x120] sm:$0xff] }
  0x48   :  { %v602_v14 = vpack.c.bf16 %v170_v7, %v168_v5  ;;  %v85_v22 = vld [vmem:[#allocation5 + $0x130] sm:$0xff]  ;;  %v88_v23 = vld [vmem:[#allocation5 + $0x148] sm:$0xff]  ;;  %v90_v24 = vld [vmem:[#allocation5 + $0x158] sm:$0xff]  ;;  %v606_v26 = vpack.c.bf16 %v174_v19, %v172_v17 }
  0x49   :  { %505 = vmatpush1.bf16.msra.mxu1 %v504_v46  ;;  %v171_v27 = vld [vmem:[#allocation5 + $0x3e0] sm:$0xff]  ;;  %v173_v28 = vld [vmem:[#allocation5 + $0x3f0] sm:$0xff]  ;;  %v178_v31 = vld [vmem:[#allocation5 + $0x418] sm:$0xff]  ;;  %v522_v32 = vpack.c.bf16 %v90_v24, %v88_v23 }
  0x4a   :  { %581 = vmatpush1.bf16.msra.mxu0 %v580_v15  ;;  %507 = vmatprep.subr.bf16.mxu1 %v506_v48  ;;  %v167_v15 = vld [vmem:[#allocation5 + $0x3c0] sm:$0xff]  ;;  %v89_v34 = vld [vmem:[#allocation5 + $0x150] sm:$0xff]  ;;  %v92_v35 = vld [vmem:[#allocation5 + $0x168] sm:$0xff]  ;;  %v608_v37 = vpack.c.bf16 %v173_v28, %v171_v27 }
  0x4b   :  { %583 = vmatprep.subr.bf16.mxu0 %v582_v18  ;;  %v516_v18 = vpack.c.bf16 %v81_v10, %v79_v9  ;;  %v604_v25 = vpack.c.bf16 %v169_v16, %v167_v15  ;;  %v87_v33 = vld [vmem:[#allocation5 + $0x140] sm:$0xff]  ;;  %v94_v36 = vld [vmem:[#allocation5 + $0x178] sm:$0xff]  ;;  %v177_v40 = vld [vmem:[#allocation5 + $0x410] sm:$0xff] }
  0x4c   :  { %v175_v39 = vld [vmem:[#allocation5 + $0x400] sm:$0xff]  ;;  %v182_v43 = vld [vmem:[#allocation5 + $0x438] sm:$0xff]  ;;  %v526_v44 = vpack.c.bf16 %v94_v36, %v92_v35  ;;  %v93_v46 = vld [vmem:[#allocation5 + $0x170] sm:$0xff] }
  0x4d   :  { %509 = vmatpush1.bf16.msra.mxu1 %v508_v58  ;;  %v91_v45 = vld [vmem:[#allocation5 + $0x160] sm:$0xff]  ;;  %v96_v47 = vld [vmem:[#allocation5 + $0x188] sm:$0xff]  ;;  %v98_v48 = vld [vmem:[#allocation5 + $0x198] sm:$0xff]  ;;  %v612_v51 = vpack.c.bf16 %v177_v40, %v175_v39 }
  0x4e   :  { %585 = vmatpush1.bf16.msra.mxu0 %v584_v29  ;;  %511 = vmatprep.subr.bf16.mxu1 %v510_v60  ;;  %v176_v29 = vld [vmem:[#allocation5 + $0x408] sm:$0xff]  ;;  %v42_v49 = vld [vmem:[#allocation2 + $0x8] sm:$0xff]  ;;  %v43_v50 = vld [vmem:[#allocation2 + $0x10] sm:$0xff]  ;;  %v528_v56 = vpack.c.bf16 %v93_v46, %v91_v45  ;;  %v530_v59 = vpack.c.bf16 %v98_v48, %v96_v47 }
  0x4f   :  { %587 = vmatprep.subr.bf16.mxu0 %v586_v30  ;;  %v520_v30 = vpack.c.bf16 %v85_v22, %v83_v21  ;;  %v610_v38 = vpack.c.bf16 %v178_v31, %v176_v29  ;;  %v179_v52 = vld [vmem:[#allocation5 + $0x420] sm:$0xff]  ;;  %315 = vmatprep.mubr.f32.mxu1 %v42_v49  ;;  %v184_v55 = vld [vmem:[#allocation5 + $0x448] sm:$0xff]  ;;  %v46_v57 = vld [vmem:[#allocation2 + $0x28] sm:$0xff] }
  0x50   :  { %v186_v58 = vld [vmem:[#allocation5 + $0x458] sm:$0xff]  ;;  %v95_v60 = vld [vmem:[#allocation5 + $0x180] sm:$0xff]  ;;  %v97_v61 = vld [vmem:[#allocation5 + $0x190] sm:$0xff] }
  0x51   :  { %513 = vmatpush1.bf16.msra.mxu1 %v512_v6  ;;  %v100_v62 = vld [vmem:[#allocation5 + $0x1a8] sm:$0xff]  ;;  %v102_v63 = vld [vmem:[#allocation5 + $0x1b8] sm:$0xff]  ;;  %v185_v3 = vld [vmem:[#allocation5 + $0x450] sm:$0xff]  ;;  %v532_v5 = vpack.c.bf16 %v97_v61, %v95_v60 }
  0x52   :  { %589 = vmatpush1.bf16.msra.mxu0 %v588_v41  ;;  %515 = vmatprep.subr.bf16.mxu1 %v514_v8  ;;  %v180_v41 = vld [vmem:[#allocation5 + $0x428] sm:$0xff]  ;;  %v190_v6 = vld [vmem:[#allocation5 + $0x478] sm:$0xff]  ;;  %v534_v7 = vpack.c.bf16 %v102_v63, %v100_v62  ;;  %v99_v8 = vld [vmem:[#allocation5 + $0x1a0] sm:$0xff] }
  0x53   :  { %591 = vmatprep.subr.bf16.mxu0 %v590_v42  ;;  %v524_v42 = vpack.c.bf16 %v89_v34, %v87_v33  ;;  %v188_v4 = vld [vmem:[#allocation5 + $0x468] sm:$0xff]  ;;  %v101_v9 = vld [vmem:[#allocation5 + $0x1b0] sm:$0xff]  ;;  %v106_v11 = vld [vmem:[#allocation5 + $0x1d8] sm:$0xff] }
  0x54   :  { %v104_v10 = vld [vmem:[#allocation5 + $0x1c8] sm:$0xff]  ;;  %v189_v15 = vld [vmem:[#allocation5 + $0x470] sm:$0xff]  ;;  %v536_v17 = vpack.c.bf16 %v101_v9, %v99_v8  ;;  %v110_v23 = vld [vmem:[#allocation5 + $0x1f8] sm:$0xff] }
  0x55   :  { %517 = vmatpush1.bf16.msra.mxu1 %v516_v18  ;;  %v192_v16 = vld [vmem:[#allocation5 + $0x488] sm:$0xff]  ;;  %v194_v18 = vld [vmem:[#allocation5 + $0x498] sm:$0xff]  ;;  %v538_v19 = vpack.c.bf16 %v106_v11, %v104_v10  ;;  %v105_v21 = vld [vmem:[#allocation5 + $0x1d0] sm:$0xff] }
  0x56   :  { %593 = vmatpush1.bf16.msra.mxu0 %v592_v53  ;;  %519 = vmatprep.subr.bf16.mxu1 %v518_v20  ;;  %v614_v53 = vpack.c.bf16 %v182_v43, %v180_v41  ;;  %v103_v20 = vld [vmem:[#allocation5 + $0x1c0] sm:$0xff]  ;;  %v108_v22 = vld [vmem:[#allocation5 + $0x1e8] sm:$0xff]  ;;  %v193_v27 = vld [vmem:[#allocation5 + $0x490] sm:$0xff] }
  0x57   :  { %595 = vmatprep.subr.bf16.mxu0 %v594_v54  ;;  %v181_v54 = vld [vmem:[#allocation5 + $0x430] sm:$0xff]  ;;  %v196_v28 = vld [vmem:[#allocation5 + $0x4a8] sm:$0xff]  ;;  %v540_v29 = vpack.c.bf16 %v105_v21, %v103_v20  ;;  %v542_v31 = vpack.c.bf16 %v110_v23, %v108_v22  ;;  %v195_v36 = vld [vmem:[#allocation5 + $0x4a0] sm:$0xff] }
  0x58   :  { %v616_v0 = vpack.c.bf16 %v181_v54, %v179_v52  ;;  %v109_v33 = vld [vmem:[#allocation5 + $0x1f0] sm:$0xff]  ;;  %v200_v39 = vld [vmem:[#allocation5 + $0x4c8] sm:$0xff]  ;;  %v202_v40 = vld [vmem:[#allocation5 + $0x4d8] sm:$0xff] }
  0x59   :  { %521 = vmatpush1.bf16.msra.mxu1 %v520_v30  ;;  %v198_v30 = vld [vmem:[#allocation5 + $0x4b8] sm:$0xff]  ;;  %v199_v43 = vld [vmem:[#allocation5 + $0x4c0] sm:$0xff]  ;;  %v41_v45 = vld [vmem:[#allocation2] sm:$0xff] }
  0x5a   :  { %597 = vmatpush1.bf16.msra.mxu0 %v596_v1  ;;  %523 = vmatprep.subr.bf16.mxu1 %v522_v32  ;;  %v618_v1 = vpack.c.bf16 %v186_v58, %v184_v55  ;;  %v107_v32 = vld [vmem:[#allocation5 + $0x1e0] sm:$0xff]  ;;  %v630_v35 = vpack.c.bf16 %v198_v30, %v196_v28  ;;  %v204_v46 = vld [vmem:[#allocation5 + $0x4e8] sm:$0xff]  ;;  %v206_v47 = vld [vmem:[#allocation5 + $0x4f8] sm:$0xff] }
  0x5b   :  { %599 = vmatprep.subr.bf16.mxu0 %v598_v2  ;;  %v183_v2 = vld [vmem:[#allocation5 + $0x440] sm:$0xff]  ;;  %v638_v49 = vpack.c.bf16 %v206_v47, %v204_v46  ;;  %v208_v52 = vld [vmem:[#allocation5 + $0x508] sm:$0xff]  ;;  %v213_v63 = vld [vmem:[#allocation5 + $0x530] sm:$0xff] }
  0x5c   :  { %v620_v12 = vpack.c.bf16 %v185_v3, %v183_v2  ;;  %v212_v58 = vld [vmem:[#allocation5 + $0x528] sm:$0xff]  ;;  %v211_v62 = vld [vmem:[#allocation5 + $0x520] sm:$0xff]  ;;  %v221_v11 = vld [vmem:[#allocation5 + $0x570] sm:$0xff] }
  0x5d   :  { %525 = vmatpush1.bf16.msra.mxu1 %v524_v42  ;;  %v634_v42 = vpack.c.bf16 %v202_v40, %v200_v39  ;;  %v648_v2 = vpack.c.bf16 %v213_v63, %v211_v62  ;;  %v219_v10 = vld [vmem:[#allocation5 + $0x560] sm:$0xff]  ;;  %v229_v23 = vld [vmem:[#allocation5 + $0x5b0] sm:$0xff]  ;;  %v236_v30 = vld [vmem:[#allocation5 + $0x5e8] sm:$0xff]  ;;  %v241_v40 = vlaneseq }
  0x5e   :  { %601 = vmatpush1.bf16.msra.mxu0 %v600_v13  ;;  %527 = vmatprep.subr.bf16.mxu1 %v526_v44  ;;  %v622_v13 = vpack.c.bf16 %v190_v6, %v188_v4  ;;  %v201_v44 = vld [vmem:[#allocation5 + $0x4d0] sm:$0xff]  ;;  %v215_v4 = vld [vmem:[#allocation5 + $0x540] sm:$0xff]  ;;  %v220_v6 = vld [vmem:[#allocation5 + $0x568] sm:$0xff] }
  0x5f   :  { %603 = vmatprep.subr.bf16.mxu0 %v602_v14  ;;  %v187_v14 = vld [vmem:[#allocation5 + $0x460] sm:$0xff]  ;;  %v636_v48 = vpack.c.bf16 %v201_v44, %v199_v43  ;;  %v239_v43 = vld [vmem:[%s830_s2] sm:$0x3] }
  0x60   :  { %v624_v24 = vpack.c.bf16 %v189_v15, %v187_v14  ;;  %v656_v14 = vpack.c.bf16 %v221_v11, %v219_v10  ;;  %v227_v22 = vld [vmem:[#allocation5 + $0x5a0] sm:$0xff] }
  0x61   :  { %529 = vmatpush1.bf16.msra.mxu1 %v528_v56  ;;  %v207_v56 = vld [vmem:[#allocation5 + $0x500] sm:$0xff] }
  0x62   :  { %605 = vmatpush1.bf16.msra.mxu0 %v604_v25  ;;  %531 = vmatprep.subr.bf16.mxu1 %v530_v59  ;;  %v626_v25 = vpack.c.bf16 %v194_v18, %v192_v16  ;;  %v214_v59 = vld [vmem:[#allocation5 + $0x538] sm:$0xff]  ;;  %v223_v16 = vld [vmem:[#allocation5 + $0x580] sm:$0xff]  ;;  %v228_v18 = vld [vmem:[#allocation5 + $0x5a8] sm:$0xff] }
  0x63   :  { %607 = vmatprep.subr.bf16.mxu0 %v606_v26  ;;  %v191_v26 = vld [vmem:[#allocation5 + $0x480] sm:$0xff]  ;;  %v646_v61 = vpack.c.bf16 %v214_v59, %v212_v58 }
  0x64   :  { %v628_v34 = vpack.c.bf16 %v193_v27, %v191_v26  ;;  %v664_v26 = vpack.c.bf16 %v229_v23, %v227_v22  ;;  %v231_v28 = vld [vmem:[#allocation5 + $0x5c0] sm:$0xff] }
  0x65   :  { %533 = vmatpush1.bf16.msra.mxu1 %v532_v5  ;;  %v217_v5 = vld [vmem:[#allocation5 + $0x550] sm:$0xff] }
  0x66   :  { %609 = vmatpush1.bf16.msra.mxu0 %v608_v37  ;;  %535 = vmatprep.subr.bf16.mxu1 %v534_v7  ;;  %v197_v37 = vld [vmem:[#allocation5 + $0x4b0] sm:$0xff]  ;;  %v222_v7 = vld [vmem:[#allocation5 + $0x578] sm:$0xff]  ;;  %v652_v8 = vpack.c.bf16 %v217_v5, %v215_v4 }
  0x67   :  { %611 = vmatprep.subr.bf16.mxu0 %v610_v38  ;;  %v544_v38 = vpack.c.bf16 %v109_v33, %v107_v32  ;;  %v632_v41 = vpack.c.bf16 %v197_v37, %v195_v36  ;;  %v654_v9 = vpack.c.bf16 %v222_v7, %v220_v6  ;;  %v45_v37 = vld [vmem:[#allocation2 + $0x20] sm:$0xff] }
  0x69   :  { %387 = vmatmul.mubr.f32.vlgmr.msra.gmra.mrb[0].mxu0 %v43_v50  ;;  %537 = vmatpush1.bf16.msra.mxu1 %v536_v17  ;;  %v203_v50 = vld [vmem:[#allocation5 + $0x4e0] sm:$0xff]  ;;  %v225_v17 = vld [vmem:[#allocation5 + $0x590] sm:$0xff] }
  0x6a   :  { %613 = vmatpush1.bf16.msra.mxu0 %v612_v51  ;;  %457 = vmatprep.mubr.f32.mxu0 %v46_v57  ;;  %v205_v51 = vld [vmem:[#allocation5 + $0x4f0] sm:$0xff]  ;;  %v660_v20 = vpack.c.bf16 %v225_v17, %v223_v16 }
  0x6b   :  { %615 = vmatprep.subr.bf16.mxu0 %v614_v53  ;;  %539 = vmatprep.subr.bf16.mxu1 %v538_v19  ;;  %v210_v53 = vld [vmem:[#allocation5 + $0x518] sm:$0xff]  ;;  %v640_v54 = vpack.c.bf16 %v205_v51, %v203_v50  ;;  %v209_v57 = vld [vmem:[#allocation5 + $0x510] sm:$0xff] }
  0x6c   :  { %v642_v55 = vpack.c.bf16 %v210_v53, %v208_v52  ;;  %v644_v60 = vpack.c.bf16 %v209_v57, %v207_v56  ;;  %v230_v19 = vld [vmem:[#allocation5 + $0x5b8] sm:$0xff] }
  0x6d   :  { %541 = vmatpush1.bf16.msra.mxu1 %v540_v29  ;;  %v662_v21 = vpack.c.bf16 %v230_v19, %v228_v18  ;;  %v233_v29 = vld [vmem:[#allocation5 + $0x5d0] sm:$0xff] }
  0x6e   :  { %617 = vmatpush1.bf16.msra.mxu0 %v616_v0  ;;  %543 = vmatprep.subr.bf16.mxu1 %v542_v31  ;;  %v216_v0 = vld [vmem:[#allocation5 + $0x548] sm:$0xff]  ;;  %v238_v31 = vld [vmem:[#allocation5 + $0x5f8] sm:$0xff]  ;;  %v668_v32 = vpack.c.bf16 %v233_v29, %v231_v28 }
  0x6f   :  { %619 = vmatprep.subr.bf16.mxu0 %v618_v1  ;;  %v218_v1 = vld [vmem:[#allocation5 + $0x558] sm:$0xff]  ;;  %v670_v33 = vpack.c.bf16 %v238_v31, %v236_v30 }
  0x70   :  { %v650_v3 = vpack.c.bf16 %v218_v1, %v216_v0 }
  0x71   :  { %545 = vmatpush1.bf16.msra.mxu1 %v544_v38 }
  0x72   :  { %621 = vmatpush1.bf16.msra.mxu0 %v620_v12  ;;  %v224_v12 = vld [vmem:[#allocation5 + $0x588] sm:$0xff] }
  0x73   :  { %623 = vmatprep.subr.bf16.mxu0 %v622_v13  ;;  %v226_v13 = vld [vmem:[#allocation5 + $0x598] sm:$0xff] }
  0x74   :  { %316 = vmatmul.mubr.f32.vlgmr.msra.gmra.mrb[0].mxu1 %v41_v45  ;;  %v658_v15 = vpack.c.bf16 %v226_v13, %v224_v12 }
  0x76   :  { %625 = vmatpush1.bf16.msra.mxu0 %v624_v24  ;;  %v232_v24 = vld [vmem:[#allocation5 + $0x5c8] sm:$0xff] }
  0x77   :  { %627 = vmatprep.subr.bf16.mxu0 %v626_v25  ;;  %v234_v25 = vld [vmem:[#allocation5 + $0x5d8] sm:$0xff] }
  0x78   :  { %v666_v27 = vpack.c.bf16 %v234_v25, %v232_v24 }
  0x7a   :  { %629 = vmatpush1.bf16.msra.mxu0 %v628_v34  ;;  %v235_v34 = vld [vmem:[#allocation5 + $0x5e0] sm:$0xff] }
  0x7b   :  { %631 = vmatprep.subr.bf16.mxu0 %v630_v35  ;;  %v237_v35 = vld [vmem:[#allocation5 + $0x5f0] sm:$0xff] }
  0x7c   :  { %v672_v36 = vpack.c.bf16 %v237_v35, %v235_v34 }
  0x7e   :  { %633 = vmatpush1.bf16.msra.mxu0 %v632_v41  ;;  %v242_v41 = vshrl.u32 %v241_v40, 7 }
  0x7f   :  { %635 = vmatprep.subr.bf16.mxu0 %v634_v42 }
  0x80   :  { %v243_v42 = vsub.s32 0, %v242_v41  ;;  %v247_v44 = vsub.s32 1, %v242_v41 }
  0x82   :  { %637 = vmatpush1.bf16.msra.mxu0 %v636_v48  ;;  %v244_v45 = vrot.slane %v239_v43, %v243_v42  ;;  %v248_v46 = vrot.slane %v239_v43, %v247_v44 }
  0x83   :  { %639 = vmatprep.subr.bf16.mxu0 %v638_v49 }
  0x86   :  { %641 = vmatpush1.bf16.msra.mxu0 %v640_v54 }
  0x87   :  { %643 = vmatprep.subr.bf16.mxu0 %v642_v55 }
  0x8a   :  { %645 = vmatpush1.bf16.msra.mxu0 %v644_v60 }
  0x8b   :  { %647 = vmatprep.subr.bf16.mxu0 %v646_v61 }
  0x8e   :  { %649 = vmatpush1.bf16.msra.mxu0 %v648_v2 }
  0x8f   :  { %651 = vmatprep.subr.bf16.mxu0 %v650_v3 }
  0x92   :  { %653 = vmatpush1.bf16.msra.mxu0 %v652_v8 }
  0x93   :  { %655 = vmatprep.subr.bf16.mxu0 %v654_v9 }
  0x96   :  { %657 = vmatpush1.bf16.msra.mxu0 %v656_v14 }
  0x97   :  { %659 = vmatprep.subr.bf16.mxu0 %v658_v15 }
  0x9a   :  { %661 = vmatpush1.bf16.msra.mxu0 %v660_v20 }
  0x9b   :  { %663 = vmatprep.subr.bf16.mxu0 %v662_v21 }
  0x9e   :  { %665 = vmatpush1.bf16.msra.mxu0 %v664_v26 }
  0x9f   :  { %667 = vmatprep.subr.bf16.mxu0 %v666_v27 }
  0xa2   :  { %669 = vmatpush1.bf16.msra.mxu0 %v668_v32 }
  0xa3   :  { %671 = vmatprep.subr.bf16.mxu0 %v670_v33 }
  0xa6   :  { %673 = vmatpush1.bf16.msra.mxu0 %v672_v36 }
  0xa9   :  { %458 = vmatmul.mubr.f32.vlgmr.msra.gmra.mrb[0].mxu0 %v45_v37 }
 0x147   :  { %v317_v38 = vpop.f32.mrb[0].mxu1 }
 0x148   :  { %v319_v39 = vpop.f32.mrb[1].mxu1  ;;  %v318_v47 = vadd.f32 %v317_v38, %v244_v45 }
 0x149   :  { %v320_v48 = vadd.f32 %v319_v39, %v248_v46 }
 0x17c   :  { %v459_v49 = vpop.f32.mrb[0].mxu0 }
 0x17d   :  { %v675_v50 = vadd.f32 %v459_v49, %v318_v47  ;;  %v461_v51 = vpop.f32.mrb[1].mxu0 }
 0x17e   :  { %v677_v52 = vadd.f32 %v461_v51, %v320_v48 }
 0x17f   :  { %464 = vst [vmem:[#allocation7] sm:$0xff] %v675_v50 }
 0x180   :  { %465 = vst [vmem:[#allocation7 + $0x8] sm:$0xff] %v677_v52 }
 0x181   :  { %740 = shalt.err (!%p737_p6)
}
 0x182   :  { %s741_s15 = scalar_lea.hbm %s831_s3, 256 }
 0x183   :  { %p742_p7 = scmp.ne.s32.totalorder %s831_s3, %s741_s15  ;;  %p745_p8 = scmp.lt.u32.totalorder %s741_s15, %s831_s3 }
 0x185   :  { %p747_p9 = pnand %p745_p8, %p742_p7 }
 0x187   :  { %750 = shalt.err (!%p747_p9)
}
 0x188   :  { %475 = dma.vmem_to_hbm [thread:$0]  %s473_s12, 256, %s831_s3, [#allocation4]  }
 0x189   :  { %755 = dma.done.wait [#allocation4], 256  }
 0x18a   :  { %756 = vsyncadd [#allocation4], 4294967040 }
 0x18b   :  { %479 = vsyncpa [#allocation3], 1 }
 0x18c   :  { %480 = vsyncpa [#allocation6], 1 }
 0x18d   :  { %481 = vsyncpa [#allocation4], 1 }

</bundles_post_ra>
